<compile_context>
chip_gen: v7x
topology: tpu7x:2x2x1
jax: 0.10.0
libtpu: 0.0.40
codegen_flags: <defaults>
</compile_context>

<pallas_src>
import functools

import jax
import jax.numpy as jnp
from jax.experimental import pallas as pl
from jax.experimental.pallas import tpu as pltpu


# --------------------------------------------------------------------------- #
# Fused kernel: SelfAttention -> masked mean pooling -> mixed + cosine sim
# Processes TB batch elements (both sequences of each) per grid step.
# --------------------------------------------------------------------------- #
def _cosine_sim_kernel(em1_ref, em2_ref, m1_ref, m2_ref,
                       w1_ref, b1_ref, w2_ref, b2_ref,
                       sim_ref, mixed_ref, *, s_valid):
    x1 = em1_ref[0]                       # (TB, S, D)
    x2 = em2_ref[0]                       # (TB, S, D)
    TB, S, D = x1.shape
    R = TB * S

    # ---- SelfAttention projection: one (2*TB*S, D) matmul for both inputs ---
    # S (and hence R) is a multiple of 8, so these reshapes are layout-free.
    xr = jnp.concatenate([x1.reshape(R, D), x2.reshape(R, D)], axis=0)  # (2R,D)
    h = jnp.maximum(
        jnp.dot(xr, w1_ref[...], preferred_element_type=jnp.float32)
        + b1_ref[...], 0.0)
    energy = (jnp.dot(h, w2_ref[...], preferred_element_type=jnp.float32)
              + b2_ref[...])
    e4 = energy.reshape(2, TB, S, D)

    # If the wrapper padded the sequence dim, kill padded positions' energy so
    # the softmax denominator matches the unpadded module exactly.
    if s_valid != S:                      # static (trace-time) branch
        seq = jax.lax.broadcasted_iota(jnp.int32, (1, 1, S, D), 2)
        e4 = jnp.where(seq < s_valid, e4, -1e30)

    # ---- softmax over the sequence dim (dim=1 of each input) ---------------
    emax = jnp.max(e4, axis=2, keepdims=True)
    ew = jnp.exp(e4 - emax)
    wsm = ew * pl.reciprocal(jnp.sum(ew, axis=2, keepdims=True), approx=True)

    weighted1 = x1 * wsm[0]               # attention output, (TB, S, D)
    weighted2 = x2 * wsm[1]

    # ---- masked mean pooling over the sequence ------------------------------
    def pool(w, m):                       # w: (TB, S, D), m: (TB, S)
        s = jnp.sum(w * m[..., None], axis=1)                       # (TB, D)
        cnt = jnp.maximum(jnp.sum(m, axis=1, keepdims=True), 1e-9)  # (TB, 1)
        return s * pl.reciprocal(cnt, approx=True)

    u = pool(weighted1, m1_ref[0])        # (TB, D)
    v = pool(weighted2, m2_ref[0])        # (TB, D)

    # ---- mixed = [u, v, |u - v|]  (one (TB, 3D) lane-contiguous store) -----
    mixed_ref[0] = jnp.concatenate([u, v, jnp.abs(u - v)], axis=-1)

    # ---- cosine similarity (per-norm eps clamp, as in F.cosine_similarity) --
    eps = 1e-8
    dot_uv = jnp.sum(u * v, axis=-1)                                 # (TB,)
    nu = jnp.maximum(jnp.sqrt(jnp.sum(u * u, axis=-1)), eps)
    nv = jnp.maximum(jnp.sqrt(jnp.sum(v * v, axis=-1)), eps)
    sim_ref[0] = (dot_uv / (nu * nv)).reshape(1, TB)                 # (1, TB)


# --------------------------------------------------------------------------- #
# Wrapper
# --------------------------------------------------------------------------- #
def cosine_sim_forward(em1, mask1, em2, mask2, params, *, tb=None):
    B, S, D = em1.shape
    assert em2.shape == (B, S, D)

    # ---- choose batch tile TB: target >=256 rows per sequence per block -----
    if tb is None:
        tb = max(1, min(B, -(-256 // S)))
        # Keep >=2 grid steps when the batch is big enough so v7x's two
        # TensorCores both get work under dimension_semantics=("parallel",).
        if tb == B and B >= 16:
            tb = -(-B // 2)
    G = -(-B // tb)
    B_pad = G * tb
    S_pad = -(-S // 8) * 8        # sublane-align seq so in-kernel reshapes are free

    def prep_em(em):
        em = em.astype(jnp.float32)
        if B_pad != B or S_pad != S:
            em = jnp.pad(em, ((0, B_pad - B), (0, S_pad - S), (0, 0)))
        return em.reshape(G, tb, S_pad, D)          # free reshape (leading dims)

    def prep_mask(m):
        m = m.astype(jnp.float32)
        if B_pad != B or S_pad != S:
            m = jnp.pad(m, ((0, B_pad - B), (0, S_pad - S)))
        return m.reshape(G, tb, S_pad)

    em1r, em2r = prep_em(em1), prep_em(em2)
    m1r, m2r = prep_mask(mask1), prep_mask(mask2)

    # nn.Linear stores [out, in]; pass pre-transposed so the kernel does x @ W.
    w1 = params["w1"].T.astype(jnp.float32)          # (D, D)
    b1 = params["b1"].reshape(1, D).astype(jnp.float32)
    w2 = params["w2"].T.astype(jnp.float32)
    b2 = params["b2"].reshape(1, D).astype(jnp.float32)

    kernel = functools.partial(_cosine_sim_kernel, s_valid=S)

    sim, mixed = pl.pallas_call(
        kernel,
        grid=(G,),
        in_specs=[
            pl.BlockSpec((1, tb, S_pad, D), lambda g: (g, 0, 0, 0)),
            pl.BlockSpec((1, tb, S_pad, D), lambda g: (g, 0, 0, 0)),
            pl.BlockSpec((1, tb, S_pad), lambda g: (g, 0, 0)),
            pl.BlockSpec((1, tb, S_pad), lambda g: (g, 0, 0)),
            pl.BlockSpec((D, D), lambda g: (0, 0)),
            pl.BlockSpec((1, D), lambda g: (0, 0)),
            pl.BlockSpec((D, D), lambda g: (0, 0)),
            pl.BlockSpec((1, D), lambda g: (0, 0)),
        ],
        out_specs=[
            pl.BlockSpec((1, 1, tb), lambda g: (g, 0, 0)),       # sim, lane-dense
            pl.BlockSpec((1, tb, 3 * D), lambda g: (g, 0, 0)),   # mixed slab
        ],
        out_shape=[
            jax.ShapeDtypeStruct((G, 1, tb), jnp.float32),
            jax.ShapeDtypeStruct((G, tb, 3 * D), jnp.float32),
        ],
        compiler_params=pltpu.CompilerParams(
            dimension_semantics=("parallel",)),
    )(em1r, em2r, m1r, m2r, w1, b1, w2, b2)

    sim = sim.reshape(B_pad)[:B]
    mixed = mixed.reshape(B_pad, 3 * D)[:B]
    return sim, mixed


# --------------------------------------------------------------------------- #
# Pure-JAX reference (mirrors the PyTorch forward) and parameter init
# --------------------------------------------------------------------------- #
def reference_forward(em1, mask1, em2, mask2, params):
    def attention(x):
        h = jnp.maximum(jnp.dot(x, params["w1"].T) + params["b1"], 0.0)
        energy = jnp.dot(h, params["w2"].T) + params["b2"]
        w = jax.nn.softmax(energy, axis=1)
        return x * w

    def pooling(x, mask):
        me = mask[..., None].astype(jnp.float32)
        s = jnp.sum(x * me, axis=1)
        d = jnp.maximum(jnp.sum(me, axis=1), 1e-9)
        return s / d

    u = pooling(attention(em1), mask1)
    v = pooling(attention(em2), mask2)
    mixed = jnp.concatenate([u, v, jnp.abs(u - v)], axis=1)
    eps = 1e-8
    nu = jnp.maximum(jnp.sqrt(jnp.sum(u * u, axis=-1)), eps)
    nv = jnp.maximum(jnp.sqrt(jnp.sum(v * v, axis=-1)), eps)
    sim = jnp.sum(u * v, axis=-1) / (nu * nv)
    return sim, mixed


def init_params(key, hidden):
    D = hidden
    keys = jax.random.split(key, 4)
    bound = 1.0 / (D ** 0.5)

    def u(k, shape):
        return jax.random.uniform(k, shape, jnp.float32, -bound, bound)

    return {
        "w1": u(keys[0], (D, D)),
        "b1": u(keys[1], (D,)),
        "w2": u(keys[2], (D, D)),
        "b2": u(keys[3], (D,)),
    }


if __name__ == "__main__":
    B, S, D = 4, 16, 32
    key = jax.random.PRNGKey(0)
    k1, k2, k3, k4, kp = jax.random.split(key, 5)

    em1 = jax.random.normal(k1, (B, S, D), jnp.float32)
    em2 = jax.random.normal(k2, (B, S, D), jnp.float32)
    mask1 = (jax.random.uniform(k3, (B, S)) > 0.2).astype(jnp.float32)
    mask2 = (jax.random.uniform(k4, (B, S)) > 0.2).astype(jnp.float32)
    mask1 = mask1.at[:, 0].set(1.0)   # keep at least one unmasked token
    mask2 = mask2.at[:, 0].set(1.0)

    params = init_params(kp, D)

    sim, mixed = cosine_sim_forward(em1, mask1, em2, mask2, params)
    sim, mixed = jax.block_until_ready((sim, mixed))

    rsim, rmixed = reference_forward(em1, mask1, em2, mask2, params)
    err = max(float(jnp.max(jnp.abs(sim - rsim))),
              float(jnp.max(jnp.abs(mixed - rmixed))))

    assert sim.shape == (B,), sim.shape
    assert mixed.shape == (B, 3 * D), mixed.shape
    assert err < 5e-3, f"max abs err vs reference: {err}"
    print("KERNEL_OK")
</pallas_src>

<mosaic_0001>
module attributes {stable_mosaic.version = 11 : i64} {
  func.func @_cosine_sim_kernel(%arg0: i32, %arg1: memref<1x4x16x32xf32, #tpu.memory_space<vmem>>, %arg2: memref<1x4x16x32xf32, #tpu.memory_space<vmem>>, %arg3: memref<1x4x16xf32, #tpu.memory_space<vmem>>, %arg4: memref<1x4x16xf32, #tpu.memory_space<vmem>>, %arg5: memref<32x32xf32, #tpu.memory_space<vmem>>, %arg6: memref<1x32xf32, #tpu.memory_space<vmem>>, %arg7: memref<32x32xf32, #tpu.memory_space<vmem>>, %arg8: memref<1x32xf32, #tpu.memory_space<vmem>>, %arg9: memref<1x1x4xf32, #tpu.memory_space<vmem>>, %arg10: memref<1x4x96xf32, #tpu.memory_space<vmem>>) attributes {dimension_semantics = [#tpu.dimension_semantics<parallel>], iteration_bounds = array<i64: 1>, scalar_prefetch = 0 : i64, scratch_operands = 0 : i64, tpu.core_type = #tpu.core_type<tc>, window_params = [{transform_indices = @transform_0, window_bounds = array<i64: 1, 4, 16, 32>}, {transform_indices = @transform_1, window_bounds = array<i64: 1, 4, 16, 32>}, {transform_indices = @transform_2, window_bounds = array<i64: 1, 4, 16>}, {transform_indices = @transform_3, window_bounds = array<i64: 1, 4, 16>}, {pipeline_mode = #tpu.pipeline_mode<synchronous>, transform_indices = @transform_4, window_bounds = array<i64: 32, 32>}, {pipeline_mode = #tpu.pipeline_mode<synchronous>, transform_indices = @transform_5, window_bounds = array<i64: 1, 32>}, {pipeline_mode = #tpu.pipeline_mode<synchronous>, transform_indices = @transform_6, window_bounds = array<i64: 32, 32>}, {pipeline_mode = #tpu.pipeline_mode<synchronous>, transform_indices = @transform_7, window_bounds = array<i64: 1, 32>}, {transform_indices = @transform_8, window_bounds = array<i64: 1, 1, 4>}, {transform_indices = @transform_9, window_bounds = array<i64: 1, 4, 96>}]} {
    %c0 = arith.constant 0 : index
    %c0_0 = arith.constant 0 : index
    %c0_1 = arith.constant 0 : index
    %c0_2 = arith.constant 0 : index
    %0 = vector.load %arg1[%c0, %c0_0, %c0_1, %c0_2] : memref<1x4x16x32xf32, #tpu.memory_space<vmem>>, vector<1x4x16x32xf32>
    %1 = vector.shape_cast %0 : vector<1x4x16x32xf32> to vector<4x16x32xf32>
    %c0_3 = arith.constant 0 : index
    %c0_4 = arith.constant 0 : index
    %c0_5 = arith.constant 0 : index
    %c0_6 = arith.constant 0 : index
    %2 = vector.load %arg2[%c0_3, %c0_4, %c0_5, %c0_6] : memref<1x4x16x32xf32, #tpu.memory_space<vmem>>, vector<1x4x16x32xf32>
    %3 = vector.shape_cast %2 : vector<1x4x16x32xf32> to vector<4x16x32xf32>
    %4 = vector.shape_cast %1 : vector<4x16x32xf32> to vector<64x32xf32>
    %5 = vector.shape_cast %3 : vector<4x16x32xf32> to vector<64x32xf32>
    %6 = tpu.concatenate %4, %5 in 0 : vector<64x32xf32>, vector<64x32xf32> -> vector<128x32xf32>
    %c0_7 = arith.constant 0 : index
    %c0_8 = arith.constant 0 : index
    %7 = vector.load %arg5[%c0_7, %c0_8] : memref<32x32xf32, #tpu.memory_space<vmem>>, vector<32x32xf32>
    %cst = arith.constant dense<0.000000e+00> : vector<128x32xf32>
    %8 = tpu.matmul %6, %7, %cst {dimension_numbers = #tpu.dot_dimension_numbers<[1], [0], [0], [1], [0, 0, 1, 1], [], []>} : vector<128x32xf32>, vector<32x32xf32>, vector<128x32xf32> -> vector<128x32xf32>
    %c0_9 = arith.constant 0 : index
    %c0_10 = arith.constant 0 : index
    %9 = vector.load %arg6[%c0_9, %c0_10] : memref<1x32xf32, #tpu.memory_space<vmem>>, vector<1x32xf32>
    %10 = vector.broadcast %9 : vector<1x32xf32> to vector<128x32xf32>
    %11 = arith.addf %8, %10 : vector<128x32xf32>
    %cst_11 = arith.constant 0.000000e+00 : f32
    %12 = vector.broadcast %cst_11 : f32 to vector<128x32xf32>
    %13 = arith.maximumf %11, %12 : vector<128x32xf32>
    %c0_12 = arith.constant 0 : index
    %c0_13 = arith.constant 0 : index
    %14 = vector.load %arg7[%c0_12, %c0_13] : memref<32x32xf32, #tpu.memory_space<vmem>>, vector<32x32xf32>
    %cst_14 = arith.constant dense<0.000000e+00> : vector<128x32xf32>
    %15 = tpu.matmul %13, %14, %cst_14 {dimension_numbers = #tpu.dot_dimension_numbers<[1], [0], [0], [1], [0, 0, 1, 1], [], []>} : vector<128x32xf32>, vector<32x32xf32>, vector<128x32xf32> -> vector<128x32xf32>
    %c0_15 = arith.constant 0 : index
    %c0_16 = arith.constant 0 : index
    %16 = vector.load %arg8[%c0_15, %c0_16] : memref<1x32xf32, #tpu.memory_space<vmem>>, vector<1x32xf32>
    %17 = vector.broadcast %16 : vector<1x32xf32> to vector<128x32xf32>
    %18 = arith.addf %15, %17 : vector<128x32xf32>
    %19 = vector.shape_cast %18 : vector<128x32xf32> to vector<2x4x16x32xf32>
    %cst_17 = arith.constant dense<0xFF800000> : vector<2x4x32xf32>
    %20 = vector.multi_reduction <maximumf>, %19, %cst_17 [2] : vector<2x4x16x32xf32> to vector<2x4x32xf32>
    %21 = vector.shape_cast %20 : vector<2x4x32xf32> to vector<2x4x1x32xf32>
    %22 = vector.broadcast %21 : vector<2x4x1x32xf32> to vector<2x4x16x32xf32>
    %23 = arith.subf %19, %22 : vector<2x4x16x32xf32>
    %24 = math.exp %23 : vector<2x4x16x32xf32>
    %cst_18 = arith.constant dense<0.000000e+00> : vector<2x4x32xf32>
    %25 = vector.multi_reduction <add>, %24, %cst_18 [2] : vector<2x4x16x32xf32> to vector<2x4x32xf32>
    %26 = vector.shape_cast %25 : vector<2x4x32xf32> to vector<2x4x1x32xf32>
    %27 = tpu.reciprocal %26 {approx = true} : vector<2x4x1x32xf32> -> vector<2x4x1x32xf32>
    %28 = vector.broadcast %27 : vector<2x4x1x32xf32> to vector<2x4x16x32xf32>
    %29 = arith.mulf %24, %28 : vector<2x4x16x32xf32>
    %30 = vector.extract_strided_slice %29 {offsets = [0, 0, 0, 0], sizes = [1, 4, 16, 32], strides = [1, 1, 1, 1]} : vector<2x4x16x32xf32> to vector<1x4x16x32xf32>
    %31 = vector.shape_cast %30 : vector<1x4x16x32xf32> to vector<4x16x32xf32>
    %32 = arith.mulf %1, %31 : vector<4x16x32xf32>
    %33 = vector.extract_strided_slice %29 {offsets = [1, 0, 0, 0], sizes = [1, 4, 16, 32], strides = [1, 1, 1, 1]} : vector<2x4x16x32xf32> to vector<1x4x16x32xf32>
    %34 = vector.shape_cast %33 : vector<1x4x16x32xf32> to vector<4x16x32xf32>
    %35 = arith.mulf %3, %34 : vector<4x16x32xf32>
    %c0_19 = arith.constant 0 : index
    %c0_20 = arith.constant 0 : index
    %c0_21 = arith.constant 0 : index
    %36 = vector.load %arg3[%c0_19, %c0_20, %c0_21] : memref<1x4x16xf32, #tpu.memory_space<vmem>>, vector<1x4x16xf32>
    %37 = vector.shape_cast %36 : vector<1x4x16xf32> to vector<4x16xf32>
    %38 = vector.shape_cast %37 : vector<4x16xf32> to vector<4x16x1xf32>
    %39 = vector.broadcast %38 : vector<4x16x1xf32> to vector<4x16x32xf32>
    %40 = arith.mulf %32, %39 : vector<4x16x32xf32>
    %cst_22 = arith.constant dense<0.000000e+00> : vector<4x32xf32>
    %41 = vector.multi_reduction <add>, %40, %cst_22 [1] : vector<4x16x32xf32> to vector<4x32xf32>
    %cst_23 = arith.constant dense<0.000000e+00> : vector<4xf32>
    %42 = vector.multi_reduction <add>, %37, %cst_23 [1] : vector<4x16xf32> to vector<4xf32>
    %43 = vector.shape_cast %42 : vector<4xf32> to vector<4x1xf32>
    %cst_24 = arith.constant 9.99999971E-10 : f32
    %44 = vector.broadcast %cst_24 : f32 to vector<4x1xf32>
    %45 = arith.maximumf %43, %44 : vector<4x1xf32>
    %46 = tpu.reciprocal %45 {approx = true} : vector<4x1xf32> -> vector<4x1xf32>
    %47 = vector.broadcast %46 : vector<4x1xf32> to vector<4x32xf32>
    %48 = arith.mulf %41, %47 : vector<4x32xf32>
    %c0_25 = arith.constant 0 : index
    %c0_26 = arith.constant 0 : index
    %c0_27 = arith.constant 0 : index
    %49 = vector.load %arg4[%c0_25, %c0_26, %c0_27] : memref<1x4x16xf32, #tpu.memory_space<vmem>>, vector<1x4x16xf32>
    %50 = vector.shape_cast %49 : vector<1x4x16xf32> to vector<4x16xf32>
    %51 = vector.shape_cast %50 : vector<4x16xf32> to vector<4x16x1xf32>
    %52 = vector.broadcast %51 : vector<4x16x1xf32> to vector<4x16x32xf32>
    %53 = arith.mulf %35, %52 : vector<4x16x32xf32>
    %cst_28 = arith.constant dense<0.000000e+00> : vector<4x32xf32>
    %54 = vector.multi_reduction <add>, %53, %cst_28 [1] : vector<4x16x32xf32> to vector<4x32xf32>
    %cst_29 = arith.constant dense<0.000000e+00> : vector<4xf32>
    %55 = vector.multi_reduction <add>, %50, %cst_29 [1] : vector<4x16xf32> to vector<4xf32>
    %56 = vector.shape_cast %55 : vector<4xf32> to vector<4x1xf32>
    %cst_30 = arith.constant 9.99999971E-10 : f32
    %57 = vector.broadcast %cst_30 : f32 to vector<4x1xf32>
    %58 = arith.maximumf %56, %57 : vector<4x1xf32>
    %59 = tpu.reciprocal %58 {approx = true} : vector<4x1xf32> -> vector<4x1xf32>
    %60 = vector.broadcast %59 : vector<4x1xf32> to vector<4x32xf32>
    %61 = arith.mulf %54, %60 : vector<4x32xf32>
    %62 = arith.subf %48, %61 : vector<4x32xf32>
    %63 = math.absf %62 : vector<4x32xf32>
    %64 = tpu.concatenate %48, %61, %63 in 1 : vector<4x32xf32>, vector<4x32xf32>, vector<4x32xf32> -> vector<4x96xf32>
    %c0_31 = arith.constant 0 : index
    %c0_32 = arith.constant 0 : index
    %c0_33 = arith.constant 0 : index
    %65 = vector.load %arg10[%c0_31, %c0_32, %c0_33] : memref<1x4x96xf32, #tpu.memory_space<vmem>>, vector<1x4x96xf32>
    %66 = vector.shape_cast %65 : vector<1x4x96xf32> to vector<4x96xf32>
    %67 = vector.shape_cast %64 : vector<4x96xf32> to vector<1x4x96xf32>
    tpu.vector_store %arg10[%c0_31, %c0_32, %c0_33], %67 {strides = array<i32>} : memref<1x4x96xf32, #tpu.memory_space<vmem>>, vector<1x4x96xf32>,
    %68 = arith.mulf %48, %61 : vector<4x32xf32>
    %cst_34 = arith.constant dense<0.000000e+00> : vector<4xf32>
    %69 = vector.multi_reduction <add>, %68, %cst_34 [1] : vector<4x32xf32> to vector<4xf32>
    %70 = arith.mulf %48, %48 : vector<4x32xf32>
    %cst_35 = arith.constant dense<0.000000e+00> : vector<4xf32>
    %71 = vector.multi_reduction <add>, %70, %cst_35 [1] : vector<4x32xf32> to vector<4xf32>
    %72 = math.sqrt %71 : vector<4xf32>
    %cst_36 = arith.constant 9.99999993E-9 : f32
    %73 = vector.broadcast %cst_36 : f32 to vector<4xf32>
    %74 = arith.maximumf %72, %73 : vector<4xf32>
    %75 = arith.mulf %61, %61 : vector<4x32xf32>
    %cst_37 = arith.constant dense<0.000000e+00> : vector<4xf32>
    %76 = vector.multi_reduction <add>, %75, %cst_37 [1] : vector<4x32xf32> to vector<4xf32>
    %77 = math.sqrt %76 : vector<4xf32>
    %cst_38 = arith.constant 9.99999993E-9 : f32
    %78 = vector.broadcast %cst_38 : f32 to vector<4xf32>
    %79 = arith.maximumf %77, %78 : vector<4xf32>
    %80 = arith.mulf %74, %79 : vector<4xf32>
    %81 = arith.divf %69, %80 : vector<4xf32>
    %82 = vector.shape_cast %81 : vector<4xf32> to vector<1x4xf32>
    %c0_39 = arith.constant 0 : index
    %c0_40 = arith.constant 0 : index
    %c0_41 = arith.constant 0 : index
    %83 = vector.load %arg9[%c0_39, %c0_40, %c0_41] : memref<1x1x4xf32, #tpu.memory_space<vmem>>, vector<1x1x4xf32>
    %84 = vector.shape_cast %83 : vector<1x1x4xf32> to vector<1x4xf32>
    %85 = vector.shape_cast %82 : vector<1x4xf32> to vector<1x1x4xf32>
    tpu.vector_store %arg9[%c0_39, %c0_40, %c0_41], %85 {strides = array<i32>} : memref<1x1x4xf32, #tpu.memory_space<vmem>>, vector<1x1x4xf32>,
    return
  }
  func.func @transform_0(%arg0: i32) -> (i32, i32, i32, i32) {
    %c0_i32 = arith.constant 0 : i32
    %c0_i32_0 = arith.constant 0 : i32
    %c0_i32_1 = arith.constant 0 : i32
    %c0_i32_2 = arith.constant 0 : i32
    return %arg0, %c0_i32, %c0_i32_0, %c0_i32_1 : i32, i32, i32, i32
  }
  func.func @transform_1(%arg0: i32) -> (i32, i32, i32, i32) {
    %c0_i32 = arith.constant 0 : i32
    %c0_i32_0 = arith.constant 0 : i32
    %c0_i32_1 = arith.constant 0 : i32
    %c0_i32_2 = arith.constant 0 : i32
    return %arg0, %c0_i32, %c0_i32_0, %c0_i32_1 : i32, i32, i32, i32
  }
  func.func @transform_2(%arg0: i32) -> (i32, i32, i32) {
    %c0_i32 = arith.constant 0 : i32
    %c0_i32_0 = arith.constant 0 : i32
    %c0_i32_1 = arith.constant 0 : i32
    return %arg0, %c0_i32, %c0_i32_0 : i32, i32, i32
  }
  func.func @transform_3(%arg0: i32) -> (i32, i32, i32) {
    %c0_i32 = arith.constant 0 : i32
    %c0_i32_0 = arith.constant 0 : i32
    %c0_i32_1 = arith.constant 0 : i32
    return %arg0, %c0_i32, %c0_i32_0 : i32, i32, i32
  }
  func.func @transform_4(%arg0: i32) -> (i32, i32) {
    %c0_i32 = arith.constant 0 : i32
    %c0_i32_0 = arith.constant 0 : i32
    %c0_i32_1 = arith.constant 0 : i32
    return %c0_i32, %c0_i32_0 : i32, i32
  }
  func.func @transform_5(%arg0: i32) -> (i32, i32) {
    %c0_i32 = arith.constant 0 : i32
    %c0_i32_0 = arith.constant 0 : i32
    %c0_i32_1 = arith.constant 0 : i32
    return %c0_i32, %c0_i32_0 : i32, i32
  }
  func.func @transform_6(%arg0: i32) -> (i32, i32) {
    %c0_i32 = arith.constant 0 : i32
    %c0_i32_0 = arith.constant 0 : i32
    %c0_i32_1 = arith.constant 0 : i32
    return %c0_i32, %c0_i32_0 : i32, i32
  }
  func.func @transform_7(%arg0: i32) -> (i32, i32) {
    %c0_i32 = arith.constant 0 : i32
    %c0_i32_0 = arith.constant 0 : i32
    %c0_i32_1 = arith.constant 0 : i32
    return %c0_i32, %c0_i32_0 : i32, i32
  }
  func.func @transform_8(%arg0: i32) -> (i32, i32, i32) {
    %c0_i32 = arith.constant 0 : i32
    %c0_i32_0 = arith.constant 0 : i32
    %c0_i32_1 = arith.constant 0 : i32
    return %arg0, %c0_i32, %c0_i32_0 : i32, i32, i32
  }
  func.func @transform_9(%arg0: i32) -> (i32, i32, i32) {
    %c0_i32 = arith.constant 0 : i32
    %c0_i32_0 = arith.constant 0 : i32
    %c0_i32_1 = arith.constant 0 : i32
    return %arg0, %c0_i32, %c0_i32_0 : i32, i32, i32
  }
}

</mosaic_0001>

<bundles_post_ra>
// kernel: tpu_custom_call.1
= control target key start
LH: loop header
LB: loop body
LE: loop exit
PB: predicated region body
PF: predicated region fallthrough
CT: control target
= control target key end

     0   :  { %15 = vsyncpa [#allocation3], 0  ;;  %s2054_s0 = inlined_call_operand.hbm [shape: f32[1,4,16,32], index: 0, kind: input, shape index: {}]   ;;  %s2055_s1 = inlined_call_operand.hbm [shape: f32[1,4,16,32], index: 1, kind: input, shape index: {}]   ;;  %s2056_s2 = inlined_call_operand.vmem [shape: f32[1,4,16], index: 2, kind: input, shape index: {}]   ;;  %s2057_s3 = inlined_call_operand.vmem [shape: f32[1,4,16], index: 3, kind: input, shape index: {}]   ;;  %s2058_s4 = inlined_call_operand.hbm [shape: f32[32,32], index: 4, kind: input, shape index: {}]   ;;  %s2059_s5 = inlined_call_operand.vmem [shape: f32[1,32], index: 5, kind: input, shape index: {}]   ;;  %s2060_s6 = inlined_call_operand.hbm [shape: f32[32,32], index: 6, kind: input, shape index: {}]   ;;  %s2061_s7 = inlined_call_operand.vmem [shape: f32[1,32], index: 7, kind: input, shape index: {}]   ;;  %s2062_s8 = inlined_call_operand.hbm [shape: f32[1,1,4], index: 8, kind: output, shape index: {0}]   ;;  %s2063_s9 = inlined_call_operand.hbm [shape: f32[1,4,96], index: 9, kind: output, shape index: {1}]  }
   0x1   :  { %16 = vsyncpa [#allocation6], 0 }
   0x2   :  { %17 = vsyncpa [#allocation9], 0 }
   0x3   :  { %18 = vsyncpa [#allocation4], 0 }
   0x4   :  { %19 = vsyncpa [#allocation12], 0  ;;  %s1508_s30 = smov [#allocation5]   ;;  %s1509_s11 = smov [#allocation2]  }
   0x5   :  { %s37_s10 = sshll.u32 %s1508_s30, 4  ;;  %s25_s12 = sshll.u32 %s1509_s11, 4  ;;  %s38_s10 = int_to_ptr.vmem [resolvable:$true] %s37_s10  ;;  %s1568_s12 = int_to_ptr.vmem [resolvable:$true] %s25_s12 }
   0x6   :  { %s1366_s15 = scalar_lea.hbm %s2055_s1, 1024 }
   0x7   :  { %p1367_p0 = scmp.ne.s32.totalorder %s2055_s1, %s1366_s15  ;;  %p1370_p1 = scmp.lt.u32.totalorder %s1366_s15, %s2055_s1 }
   0x9   :  { %p1372_p2 = pnand %p1370_p1, %p1367_p0 }
   0xb   :  { %1375 = shalt.err (!%p1372_p2)
}
   0xc   :  { %s1376_s20 = scalar_lea.vmem %s38_s10, 1024  ;;  %p1381_p4 = scmp.lt.s32.totalorder %s38_s10, %s38_s10 }
   0xd   :  { %p1377_p3 = scmp.ne.s32.totalorder %s38_s10, %s1376_s20  ;;  %p1382_p5 = scmp.lt.s32.totalorder %s1376_s20, %s1376_s20 }
   0xf   :  { %p1383_p6 = por %p1382_p5, %p1381_p4 }
  0x11   :  { %p1384_p7 = pnand %p1383_p6, %p1377_p3 }
  0x13   :  { %1387 = shalt.err (!%p1384_p7)
}
  0x14   :  { %s1510_s21 = smov 128   ;;  %s1511_s22 = smov 8  }
  0x15   :  { %43 = dma.hbm_to_vmem [thread:$0]  %s2055_s1, 1024, %s38_s10, [#allocation6], %s1510_s21, %s1510_s21, %s1511_s22  }
  0x16   :  { %s1388_s27 = scalar_lea.hbm %s2054_s0, 1024 }
  0x17   :  { %p1389_p8 = scmp.ne.s32.totalorder %s2054_s0, %s1388_s27  ;;  %p1392_p9 = scmp.lt.u32.totalorder %s1388_s27, %s2054_s0 }
  0x19   :  { %p1394_p10 = pnand %p1392_p9, %p1389_p8 }
  0x1b   :  { %1397 = shalt.err (!%p1394_p10)
}
  0x1c   :  { %s1398_s13 = scalar_lea.vmem %s1568_s12, 1024  ;;  %p1403_p12 = scmp.lt.s32.totalorder %s1568_s12, %s1568_s12 }
  0x1d   :  { %p1399_p11 = scmp.ne.s32.totalorder %s1568_s12, %s1398_s13  ;;  %p1404_p13 = scmp.lt.s32.totalorder %s1398_s13, %s1398_s13 }
  0x1f   :  { %p1405_p0 = por %p1404_p13, %p1403_p12 }
  0x21   :  { %p1406_p1 = pnand %p1405_p0, %p1399_p11 }
  0x23   :  { %1409 = shalt.err (!%p1406_p1)
}
  0x24   :  { %31 = dma.hbm_to_vmem [thread:$0]  %s2054_s0, 1024, %s1568_s12, [#allocation3], %s1510_s21, %s1510_s21, %s1511_s22  }
  0x25   :  { %s1512_s14 = smov [#allocation7]   ;;  %s1513_s16 = smov [#allocation8]  }
  0x26   :  { %s53_s15 = sshll.u32 %s1512_s14, 4  ;;  %s67_s17 = sshll.u32 %s1513_s16, 4  ;;  %s54_s15 = int_to_ptr.vmem [resolvable:$true] %s53_s15  ;;  %s1605_s17 = int_to_ptr.vmem [resolvable:$true] %s67_s17 }
  0x27   :  { %s1410_s20 = scalar_lea.hbm %s2058_s4, 512 }
  0x28   :  { %p1411_p2 = scmp.ne.s32.totalorder %s2058_s4, %s1410_s20  ;;  %p1414_p3 = scmp.lt.u32.totalorder %s1410_s20, %s2058_s4 }
  0x2a   :  { %p1416_p4 = pnand %p1414_p3, %p1411_p2 }
  0x2c   :  { %1419 = shalt.err (!%p1416_p4)
}
  0x2d   :  { %s1420_s0 = scalar_lea.vmem %s54_s15, 512  ;;  %p1425_p6 = scmp.lt.s32.totalorder %s54_s15, %s54_s15 }
  0x2e   :  { %p1421_p5 = scmp.ne.s32.totalorder %s54_s15, %s1420_s0  ;;  %p1426_p7 = scmp.lt.s32.totalorder %s1420_s0, %s1420_s0 }
  0x30   :  { %p1427_p8 = por %p1426_p7, %p1425_p6 }
  0x32   :  { %p1428_p9 = pnand %p1427_p8, %p1421_p5 }
  0x34   :  { %1431 = shalt.err (!%p1428_p9)
}
  0x35   :  { %59 = dma.hbm_to_vmem [thread:$0]  %s2058_s4, 512, %s54_s15, [#allocation6], %s1510_s21, %s1510_s21, %s1511_s22  }
  0x36   :  { %s1432_s30 = scalar_lea.hbm %s2060_s6, 512 }
  0x37   :  { %p1433_p10 = scmp.ne.s32.totalorder %s2060_s6, %s1432_s30  ;;  %p1436_p11 = scmp.lt.u32.totalorder %s1432_s30, %s2060_s6 }
  0x39   :  { %p1438_p12 = pnand %p1436_p11, %p1433_p10 }
  0x3b   :  { %1441 = shalt.err (!%p1438_p12)
}
  0x3c   :  { %s1442_s14 = scalar_lea.vmem %s1605_s17, 512  ;;  %p1447_p0 = scmp.lt.s32.totalorder %s1605_s17, %s1605_s17 }
  0x3d   :  { %p1443_p13 = scmp.ne.s32.totalorder %s1605_s17, %s1442_s14  ;;  %p1448_p1 = scmp.lt.s32.totalorder %s1442_s14, %s1442_s14 }
  0x3f   :  { %p1449_p2 = por %p1448_p1, %p1447_p0 }
  0x41   :  { %p1450_p3 = pnand %p1449_p2, %p1443_p13 }
  0x43   :  { %1453 = shalt.err (!%p1450_p3)
}
  0x44   :  { %73 = dma.hbm_to_vmem [thread:$0]  %s2060_s6, 512, %s1605_s17, [#allocation9], %s1510_s21, %s1510_s21, %s1511_s22  }
  0x45   :  { %1498 = dma.done.wait [#allocation3], 1024  }
  0x46   :  { %1499 = vsyncadd [#allocation3], 4294966272 }
  0x47   :  { %1500 = dma.done.wait [#allocation6], 1536  }
  0x48   :  { %1501 = vsyncadd [#allocation6], 4294965760 }
  0x49   :  { %1502 = dma.done.wait [#allocation9], 512  }
  0x4a   :  { %1503 = vsyncadd [#allocation9], 4294966784  ;;  %vm115_vm0 = vcmask 261120   ;;  %v104_v0 = vld [vmem:[#allocation7] sm:$0xff]  ;;  %v105_v1 = vld [vmem:[#allocation7 + $0x8] sm:$0xff]  ;;  %vm850_vm1 = vcmask 125952   ;;  %v762_v30 = vlaneseq }
  0x4b   :  { %v106_v2 = vld [vmem:[#allocation7 + $0x10] sm:$0xff]  ;;  %v1280_v3 = vpack.c.bf16 %v105_v1, %v104_v0  ;;  %v107_v4 = vld [vmem:[#allocation7 + $0x18] sm:$0xff]  ;;  %v1642_v5 = vld [vmem:[#allocation2] sm:$0xff]  ;;  %vm987_vm2 = vcmask 1041409   ;;  %vm990_vm3 = vcmask 1042434   ;;  %vm993_vm4 = vcmask 1043459  }
  0x4c   :  { %v1284_v6 = vpack.c.bf16 %v107_v4, %v106_v2  ;;  %1224 = vmatprep.mubr.msk.f32.mxu0 %vm115_vm0, %v1642_v5  ;;  %v325_v7 = vld [vmem:[#allocation8] sm:$0xff]  ;;  %v326_v8 = vld [vmem:[#allocation8 + $0x8] sm:$0xff]  ;;  %v1648_v11 = vld [vmem:[#allocation2 + $0x10] sm:$0xff]  ;;  %v1707_v32 = vshrl.u32 %v762_v30, 7  ;;  %vm1042_vm5 = vcmask 257024   ;;  %s1515_s18 = smov 64  }
  0x4d   :  { %1281 = vmatprep.subr.bf16.mxu0 %v1280_v3  ;;  %v1646_v9 = vld [vmem:[#allocation2 + $0x8] sm:$0xff]  ;;  %v1288_v10 = vpack.c.bf16 %v326_v8, %v325_v7  ;;  %v1654_v12 = vld [vmem:[#allocation2 + $0x18] sm:$0xff]  ;;  %v1656_v13 = vld [vmem:[#allocation2 + $0x20] sm:$0xff]  ;;  %s1516_s19 = smov [#allocation11]   ;;  %vm1023_vm6 = vcmask 523264   ;;  %vm1025_vm7 = vcmask 781312  }
  0x4e   :  { %1283 = vmatpush3.bf16.msra.mxu0 %v1280_v3  ;;  %v1662_v14 = vld [vmem:[#allocation2 + $0x28] sm:$0xff]  ;;  %v1664_v15 = vld [vmem:[#allocation2 + $0x30] sm:$0xff]  ;;  %v1670_v16 = vld [vmem:[#allocation2 + $0x38] sm:$0xff]  ;;  %v775_v34 = vsub.s32 1, %v1707_v32  ;;  %v786_v37 = vsub.s32 2, %v1707_v32  ;;  %v764_v40 = vsub.s32 0, %v1707_v32 }
  0x4f   :  { %1285 = vmatprep.subr.bf16.mxu0 %v1284_v6  ;;  %1289 = vmatprep.subr.bf16.mxu1 %v1288_v10  ;;  %v1672_v17 = vld [vmem:[#allocation5] sm:$0xff]  ;;  %v1678_v18 = vld [vmem:[#allocation5 + $0x8] sm:$0xff]  ;;  %v1680_v19 = vld [vmem:[#allocation5 + $0x10] sm:$0xff]  ;;  %v797_v42 = vsub.s32 3, %v1707_v32  ;;  %s1127_s20 = sshll.u32 %s1516_s19, 4  ;;  %s1128_s20 = int_to_ptr.vmem [resolvable:$true] %s1127_s20 }
  0x50   :  { %1291 = vmatpush3.bf16.msra.mxu1 %v1288_v10  ;;  %v1686_v20 = vld [vmem:[#allocation5 + $0x18] sm:$0xff]  ;;  %v1688_v21 = vld [vmem:[#allocation5 + $0x20] sm:$0xff]  ;;  %v1694_v22 = vld [vmem:[#allocation5 + $0x28] sm:$0xff]  ;;  %s1454_s23 = scalar_lea.vmem %s1128_s20, 64  ;;  %p1459_p5 = scmp.lt.s32.totalorder %s1128_s20, %s1128_s20 }
  0x51   :  { %v102_v23 = vld [vmem:[#allocation5 + $0x30] sm:$0xff]  ;;  %v103_v24 = vld [vmem:[#allocation5 + $0x38] sm:$0xff]  ;;  %v761_v28 = vld [vmem:[%s2056_s2] sm:$0xf]  ;;  %p1455_p4 = scmp.ne.s32.totalorder %s1128_s20, %s1454_s23  ;;  %p1460_p6 = scmp.lt.s32.totalorder %s1454_s23, %s1454_s23 }
  0x52   :  { %1287 = vmatpush3.bf16.msra.mxu0 %v1284_v6  ;;  %v327_v25 = vld [vmem:[#allocation8 + $0x10] sm:$0xff]  ;;  %v328_v26 = vld [vmem:[#allocation8 + $0x18] sm:$0xff]  ;;  %v868_v29 = vld [vmem:[%s2057_s3] sm:$0xf]  ;;  %v851_v31 = vsel %vm850_vm1, %v761_v28, 0.0  ;;  %v776_v35 = vrot.slane %v761_v28, %v775_v34  ;;  %v787_v38 = vrot.slane %v761_v28, %v786_v37  ;;  %v765_v41 = vrot.slane %v761_v28, %v764_v40 }
  0x53   :  { %v1292_v27 = vpack.c.bf16 %v328_v26, %v327_v25  ;;  %852 = vadd.xlane.f32.xlu0 %v851_v31  ;;  %v957_v33 = vsel %vm850_vm1, %v868_v29, 0.0  ;;  %v883_v36 = vrot.slane %v868_v29, %v775_v34  ;;  %v894_v39 = vrot.slane %v868_v29, %v786_v37  ;;  %v1142_v46 = vld [vmem:[%s2059_s5] ss:$0 sm:$0xff]  ;;  %p1461_p7 = por %p1460_p6, %p1459_p5 }
  0x54   :  { %778 = vbcast.lane.b32.xlu1 %v776_v35, 256  ;;  %v798_v43 = vrot.slane %v761_v28, %v797_v42  ;;  %v872_v44 = vrot.slane %v868_v29, %v764_v40  ;;  %v905_v45 = vrot.slane %v868_v29, %v797_v42 }
  0x55   :  { %1225 = vmatmul.mubr.msk.f32.vlgmr.msra.gmra.mrb[0].mxu0 %vm115_vm0, %v1646_v9  ;;  %1293 = vmatprep.subr.bf16.mxu1 %v1292_v27  ;;  %p1462_p8 = pnand %p1461_p7, %p1455_p4 }
  0x56   :  { %1227 = vmatprep.mubr.msk.f32.mxu0 %vm115_vm0, %v1648_v11  ;;  %1295 = vmatpush3.bf16.msra.mxu1 %v1292_v27 }
  0x57   :  { %958 = vadd.xlane.f32.xlu0 %v957_v33 }
  0x58   :  { %782 = vbcast.lane.b32.xlu1 %v776_v35, 264 }
  0x59   :  { %1228 = vmatmul.mubr.msk.f32.gmra.mrb[2].mxu0 %vm115_vm0, %v1654_v12 }
  0x5a   :  { %1230 = vmatprep.mubr.msk.f32.mxu0 %vm115_vm0, %v1656_v13 }
  0x5c   :  { %889 = vbcast.lane.b32.xlu1 %v883_v36, 264 }
  0x5d   :  { %1231 = vmatmul.mubr.msk.f32.gmra.mrb[4].mxu0 %vm115_vm0, %v1662_v14 }
  0x5e   :  { %1233 = vmatprep.mubr.msk.f32.mxu0 %vm115_vm0, %v1664_v15 }
  0x60   :  { %789 = vbcast.lane.b32.xlu1 %v787_v38, 256 }
  0x61   :  { %1234 = vmatmul.mubr.msk.f32.gmra.mrb[6].mxu0 %vm115_vm0, %v1670_v16 }
  0x62   :  { %1236 = vmatprep.mubr.msk.f32.mxu0 %vm115_vm0, %v1672_v17 }
  0x64   :  { %793 = vbcast.lane.b32.xlu1 %v787_v38, 264 }
  0x65   :  { %1237 = vmatmul.mubr.msk.f32.gmra.mrb[8].mxu0 %vm115_vm0, %v1678_v18 }
  0x66   :  { %1239 = vmatprep.mubr.msk.f32.mxu0 %vm115_vm0, %v1680_v19 }
  0x68   :  { %896 = vbcast.lane.b32.xlu1 %v894_v39, 256 }
  0x69   :  { %1240 = vmatmul.mubr.msk.f32.gmra.mrb[10].mxu0 %vm115_vm0, %v1686_v20 }
  0x6a   :  { %1242 = vmatprep.mubr.msk.f32.mxu0 %vm115_vm0, %v1688_v21 }
  0x6c   :  { %900 = vbcast.lane.b32.xlu1 %v894_v39, 264 }
  0x6d   :  { %1243 = vmatmul.mubr.msk.f32.gmra.mrb[12].mxu0 %vm115_vm0, %v1694_v22  ;;  %885 = vbcast.lane.b32.xlu0 %v883_v36, 256 }
  0x6e   :  { %1245 = vmatprep.mubr.msk.f32.mxu0 %vm115_vm0, %v102_v23 }
  0x70   :  { %767 = vbcast.lane.b32.xlu1 %v765_v41, 256 }
  0x71   :  { %1246 = vmatmul.mubr.msk.f32.gmra.mrb[14].mxu0 %vm115_vm0, %v103_v24  ;;  %771 = vbcast.lane.b32.xlu0 %v765_v41, 264 }
  0x74   :  { %800 = vbcast.lane.b32.xlu1 %v798_v43, 256 }
  0x75   :  { %804 = vbcast.lane.b32.xlu0 %v798_v43, 264 }
  0x78   :  { %874 = vbcast.lane.b32.xlu1 %v872_v44, 256 }
  0x79   :  { %878 = vbcast.lane.b32.xlu0 %v872_v44, 264 }
  0x7c   :  { %907 = vbcast.lane.b32.xlu1 %v905_v45, 256 }
  0x7d   :  { %911 = vbcast.lane.b32.xlu0 %v905_v45, 264 }
 0x128   :  { %v1226_v47 = vpop.f32.mrb[0].mxu0 }
 0x129   :  { %v236_v48 = vadd.f32 %v1226_v47, %v1142_v46  ;;  %v230_v49 = vpop.f32.mrb[1].mxu0 }
 0x12a   :  { %v231_v50 = vadd.f32 %v1142_v46, %v230_v49 }
 0x12b   :  { %v310_v53 = vmax.f32 %v236_v48, 0.0  ;;  %v1735_v48 = vld [vmem:[%s2061_s7] ss:$0 sm:$0xff]  ;;  %s1514_s7 = smov 32  }
 0x12c   :  { %v309_v51 = vmax.f32 %v231_v50, 0.0  ;;  %v1229_v52 = vpop.f32.mrb[2].mxu0 }
 0x12d   :  { %v246_v54 = vadd.f32 %v1229_v52, %v1142_v46  ;;  %v240_v55 = vpop.f32.mrb[3].mxu0 }
 0x12e   :  { %v241_v56 = vadd.f32 %v1142_v46, %v240_v55  ;;  %1256 = vmatprep.mubr.msk.f32.mxu1 %vm115_vm0, %v309_v51 }
 0x12f   :  { %1257 = vmatmul.mubr.msk.f32.vlgmr.msra.gmra.mrb[0].mxu1 %vm115_vm0, %v310_v53  ;;  %v312_v59 = vmax.f32 %v246_v54, 0.0 }
 0x130   :  { %v311_v57 = vmax.f32 %v241_v56, 0.0  ;;  %v1232_v58 = vpop.f32.mrb[4].mxu0 }
 0x131   :  { %v256_v60 = vadd.f32 %v1232_v58, %v1142_v46  ;;  %v250_v61 = vpop.f32.mrb[5].mxu0 }
 0x132   :  { %v251_v62 = vadd.f32 %v1142_v46, %v250_v61  ;;  %1259 = vmatprep.mubr.msk.f32.mxu1 %vm115_vm0, %v311_v57 }
 0x133   :  { %1260 = vmatmul.mubr.msk.f32.gmra.mrb[2].mxu1 %vm115_vm0, %v312_v59  ;;  %v314_v1 = vmax.f32 %v256_v60, 0.0 }
 0x134   :  { %v313_v63 = vmax.f32 %v251_v62, 0.0  ;;  %v1235_v0 = vpop.f32.mrb[6].mxu0 }
 0x135   :  { %v266_v2 = vadd.f32 %v1235_v0, %v1142_v46  ;;  %v260_v3 = vpop.f32.mrb[7].mxu0 }
 0x136   :  { %v261_v4 = vadd.f32 %v1142_v46, %v260_v3  ;;  %1262 = vmatprep.mubr.msk.f32.mxu1 %vm115_vm0, %v313_v63 }
 0x137   :  { %1263 = vmatmul.mubr.msk.f32.gmra.mrb[4].mxu1 %vm115_vm0, %v314_v1  ;;  %v316_v8 = vmax.f32 %v266_v2, 0.0 }
 0x138   :  { %v315_v6 = vmax.f32 %v261_v4, 0.0  ;;  %v1238_v7 = vpop.f32.mrb[8].mxu0 }
 0x139   :  { %v276_v10 = vadd.f32 %v1238_v7, %v1142_v46  ;;  %v270_v23 = vpop.f32.mrb[9].mxu0 }
 0x13a   :  { %v271_v24 = vadd.f32 %v1142_v46, %v270_v23  ;;  %1265 = vmatprep.mubr.msk.f32.mxu1 %vm115_vm0, %v315_v6 }
 0x13b   :  { %1266 = vmatmul.mubr.msk.f32.gmra.mrb[6].mxu1 %vm115_vm0, %v316_v8  ;;  %v318_v27 = vmax.f32 %v276_v10, 0.0 }
 0x13c   :  { %v317_v25 = vmax.f32 %v271_v24, 0.0  ;;  %v1241_v26 = vpop.f32.mrb[10].mxu0 }
 0x13d   :  { %v286_v28 = vadd.f32 %v1241_v26, %v1142_v46  ;;  %v280_v29 = vpop.f32.mrb[11].mxu0 }
 0x13e   :  { %v281_v31 = vadd.f32 %v1142_v46, %v280_v29  ;;  %1268 = vmatprep.mubr.msk.f32.mxu1 %vm115_vm0, %v317_v25 }
 0x13f   :  { %1269 = vmatmul.mubr.msk.f32.gmra.mrb[8].mxu1 %vm115_vm0, %v318_v27  ;;  %v320_v35 = vmax.f32 %v286_v28, 0.0 }
 0x140   :  { %v319_v33 = vmax.f32 %v281_v31, 0.0  ;;  %v1244_v34 = vpop.f32.mrb[12].mxu0 }
 0x141   :  { %v296_v36 = vadd.f32 %v1244_v34, %v1142_v46  ;;  %v290_v37 = vpop.f32.mrb[13].mxu0 }
 0x142   :  { %v291_v38 = vadd.f32 %v1142_v46, %v290_v37  ;;  %1271 = vmatprep.mubr.msk.f32.mxu1 %vm115_vm0, %v319_v33 }
 0x143   :  { %1272 = vmatmul.mubr.msk.f32.gmra.mrb[10].mxu1 %vm115_vm0, %v320_v35  ;;  %v322_v41 = vmax.f32 %v296_v36, 0.0  ;;  %v853_v35 = vpop.xlane.xlu0 %852 }
 0x144   :  { %v321_v39 = vmax.f32 %v291_v38, 0.0  ;;  %v1247_v40 = vpop.f32.mrb[14].mxu0  ;;  %v854_v38 = vmax.f32 %v853_v35, 1e-09 }
 0x145   :  { %v306_v42 = vadd.f32 %v1247_v40, %v1142_v46  ;;  %v300_v43 = vpop.f32.mrb[15].mxu0 }
 0x146   :  { %v301_v44 = vadd.f32 %v1142_v46, %v300_v43  ;;  %1274 = vmatprep.mubr.msk.f32.mxu1 %vm115_vm0, %v321_v39  ;;  %1306 = vrcp.f32 %v854_v38 }
 0x147   :  { %1275 = vmatmul.mubr.msk.f32.gmra.mrb[12].mxu1 %vm115_vm0, %v322_v41  ;;  %v324_v47 = vmax.f32 %v306_v42, 0.0 }
 0x148   :  { %v323_v45 = vmax.f32 %v301_v44, 0.0 }
 0x14a   :  { %1277 = vmatprep.mubr.msk.f32.mxu1 %vm115_vm0, %v323_v45 }
 0x14b   :  { %1278 = vmatmul.mubr.msk.f32.gmra.mrb[14].mxu1 %vm115_vm0, %v324_v47 }
 0x202   :  { %v1258_v49 = vpop.f32.mrb[0].mxu1 }
 0x203   :  { %v456_v50 = vadd.f32 %v1258_v49, %v1735_v48  ;;  %v450_v51 = vpop.f32.mrb[1].mxu1 }
 0x204   :  { %v451_v46 = vadd.f32 %v1735_v48, %v450_v51 }
 0x205   :  { %v530_v52 = vsel %vm115_vm0, %v456_v50, -inf }
 0x206   :  { %v529_v53 = vsel %vm115_vm0, %v451_v46, -inf  ;;  %v1261_v54 = vpop.f32.mrb[2].mxu1 }
 0x207   :  { %v531_v55 = vmax.f32 %v529_v53, %v530_v52  ;;  %v1742_v56 = vadd.f32 %v1261_v54, %v1735_v48  ;;  %v460_v57 = vpop.f32.mrb[3].mxu1 }
 0x208   :  { %v1745_v58 = vadd.f32 %v1735_v48, %v460_v57 }
 0x209   :  { %v532_v59 = vrot.slane %v531_v55, 4  ;;  %v539_v60 = vsel %vm115_vm0, %v1742_v56, -inf }
 0x20a   :  { %v538_v61 = vsel %vm115_vm0, %v1745_v58, -inf  ;;  %v1264_v62 = vpop.f32.mrb[4].mxu1 }
 0x20b   :  { %v533_v63 = vmax.f32 %v531_v55, %v532_v59  ;;  %v540_v0 = vmax.f32 %v538_v61, %v539_v60  ;;  %v1752_v1 = vadd.f32 %v1264_v62, %v1735_v48  ;;  %v470_v2 = vpop.f32.mrb[5].mxu1 }
 0x20c   :  { %v1755_v3 = vadd.f32 %v1735_v48, %v470_v2 }
 0x20d   :  { %v534_v4 = vrot.slane %v533_v63, 2  ;;  %v541_v6 = vrot.slane %v540_v0, 4  ;;  %v548_v7 = vsel %vm115_vm0, %v1752_v1, -inf }
 0x20e   :  { %v547_v8 = vsel %vm115_vm0, %v1755_v3, -inf  ;;  %v1267_v10 = vpop.f32.mrb[6].mxu1 }
 0x20f   :  { %v535_v23 = vmax.f32 %v533_v63, %v534_v4  ;;  %v542_v24 = vmax.f32 %v540_v0, %v541_v6  ;;  %v549_v25 = vmax.f32 %v547_v8, %v548_v7  ;;  %v1762_v26 = vadd.f32 %v1267_v10, %v1735_v48  ;;  %v480_v27 = vpop.f32.mrb[7].mxu1  ;;  %v1787_v4 = vpop.permute.xlu1 %778 }
 0x210   :  { %v1765_v28 = vadd.f32 %v1735_v48, %v480_v27 }
 0x211   :  { %v536_v29 = vrot.slane %v535_v23, 1  ;;  %v543_v31 = vrot.slane %v542_v24, 2  ;;  %v550_v33 = vrot.slane %v549_v25, 4  ;;  %v557_v34 = vsel %vm115_vm0, %v1762_v26, -inf }
 0x212   :  { %v556_v36 = vsel %vm115_vm0, %v1765_v28, -inf  ;;  %v1270_v37 = vpop.f32.mrb[8].mxu1 }
 0x213   :  { %v537_v39 = vmax.f32 %v535_v23, %v536_v29  ;;  %v544_v40 = vmax.f32 %v542_v24, %v543_v31  ;;  %v551_v41 = vmax.f32 %v549_v25, %v550_v33  ;;  %v558_v42 = vmax.f32 %v556_v36, %v557_v34  ;;  %v490_v43 = vpop.f32.mrb[9].mxu1 }
 0x214   :  { %v1772_v44 = vadd.f32 %v1270_v37, %v1735_v48  ;;  %v1775_v45 = vadd.f32 %v1735_v48, %v490_v43 }
 0x215   :  { %v601_v47 = vsub.f32 %v451_v46, %v537_v39  ;;  %v602_v49 = vsub.f32 %v456_v50, %v537_v39  ;;  %v545_v51 = vrot.slane %v544_v40, 1  ;;  %v552_v52 = vrot.slane %v551_v41, 2 }
 0x216   :  { %v559_v53 = vrot.slane %v558_v42, 4  ;;  %v566_v54 = vsel %vm115_vm0, %v1772_v44, -inf  ;;  %v565_v55 = vsel %vm115_vm0, %v1775_v45, -inf  ;;  %v1273_v57 = vpop.f32.mrb[10].mxu1 }
 0x217   :  { %v617_v59 = vmul.f32 1.442695, %v601_v47  ;;  %v619_v60 = vmul.f32 1.442695, %v602_v49  ;;  %v546_v61 = vmax.f32 %v544_v40, %v545_v51  ;;  %v553_v62 = vmax.f32 %v551_v41, %v552_v52  ;;  %v500_v63 = vpop.f32.mrb[11].mxu1  ;;  %v1803_v47 = vpop.permute.xlu1 %782 }
 0x218   :  { %v560_v0 = vmax.f32 %v558_v42, %v559_v53  ;;  %v567_v2 = vmax.f32 %v565_v55, %v566_v54  ;;  %v1782_v50 = vadd.f32 %v1273_v57, %v1735_v48  ;;  %v1785_v46 = vadd.f32 %v1735_v48, %v500_v63  ;;  %v1809_v53 = vpop.eup %1306 }
 0x219   :  { %1308 = vpow2.f32 %v617_v59  ;;  %v603_v6 = vsub.f32 %v1745_v58, %v546_v61  ;;  %v604_v7 = vsub.f32 %v1742_v56, %v546_v61  ;;  %v554_v8 = vrot.slane %v553_v62, 1 }
 0x21a   :  { %1310 = vpow2.f32 %v619_v60  ;;  %v561_v10 = vrot.slane %v560_v0, 2  ;;  %v568_v23 = vrot.slane %v567_v2, 4  ;;  %v575_v24 = vsel %vm115_vm0, %v1782_v50, -inf  ;;  %v1276_v25 = vpop.f32.mrb[12].mxu1 }
 0x21b   :  { %v621_v27 = vmul.f32 1.442695, %v603_v6  ;;  %v623_v29 = vmul.f32 1.442695, %v604_v7  ;;  %v555_v31 = vmax.f32 %v553_v62, %v554_v8  ;;  %v574_v33 = vsel %vm115_vm0, %v1785_v46, -inf  ;;  %v510_v34 = vpop.f32.mrb[13].mxu1 }
 0x21c   :  { %v562_v35 = vmax.f32 %v560_v0, %v561_v10  ;;  %v569_v36 = vmax.f32 %v567_v2, %v568_v23  ;;  %v576_v58 = vmax.f32 %v574_v33, %v575_v24  ;;  %v1796_v56 = vadd.f32 %v1276_v25, %v1735_v48 }
 0x21d   :  { %1312 = vpow2.f32 %v621_v27  ;;  %v605_v37 = vsub.f32 %v1755_v3, %v555_v31  ;;  %v606_v38 = vsub.f32 %v1752_v1, %v555_v31  ;;  %v1801_v39 = vadd.f32 %v1735_v48, %v510_v34 }
 0x21e   :  { %1314 = vpow2.f32 %v623_v29  ;;  %v563_v40 = vrot.slane %v562_v35, 1  ;;  %v570_v41 = vrot.slane %v569_v36, 2  ;;  %v577_v42 = vrot.slane %v576_v58, 4  ;;  %v1279_v43 = vpop.f32.mrb[14].mxu1 }
 0x21f   :  { %v625_v49 = vmul.f32 1.442695, %v605_v37  ;;  %v627_v51 = vmul.f32 1.442695, %v606_v38  ;;  %v584_v52 = vsel %vm115_vm0, %v1796_v56, -inf  ;;  %v583_v3 = vsel %vm115_vm0, %v1801_v39, -inf }
 0x220   :  { %v564_v1 = vmax.f32 %v562_v35, %v563_v40  ;;  %v571_v54 = vmax.f32 %v569_v36, %v570_v41  ;;  %v578_v55 = vmax.f32 %v576_v58, %v577_v42  ;;  %v585_v57 = vmax.f32 %v583_v3, %v584_v52  ;;  %v520_v59 = vpop.f32.mrb[15].mxu1 }
 0x221   :  { %1316 = vpow2.f32 %v625_v49  ;;  %v1812_v60 = vadd.f32 %v1279_v43, %v1735_v48  ;;  %v1815_v61 = vadd.f32 %v1735_v48, %v520_v59 }
 0x222   :  { %1318 = vpow2.f32 %v627_v51  ;;  %v607_v62 = vsub.f32 %v1765_v28, %v564_v1  ;;  %v608_v63 = vsub.f32 %v1762_v26, %v564_v1  ;;  %v572_v0 = vrot.slane %v571_v54, 1  ;;  %v1829_v26 = vpop.permute.xlu1 %889 }
 0x223   :  { %v1819_v2 = vpop.eup %1308  ;;  %v579_v6 = vrot.slane %v578_v55, 2  ;;  %v586_v7 = vrot.slane %v585_v57, 4  ;;  %v593_v8 = vsel %vm115_vm0, %v1812_v60, -inf  ;;  %v592_v10 = vsel %vm115_vm0, %v1815_v61, -inf }
 0x224   :  { %v1825_v23 = vpop.eup %1310  ;;  %v649_v48 = vsel %vm115_vm0, %v1819_v2, 0.0  ;;  %v629_v24 = vmul.f32 1.442695, %v607_v62  ;;  %v631_v28 = vmul.f32 1.442695, %v608_v63  ;;  %v573_v25 = vmax.f32 %v571_v54, %v572_v0 }
 0x225   :  { %v650_v27 = vsel %vm115_vm0, %v1825_v23, 0.0  ;;  %v580_v29 = vmax.f32 %v578_v55, %v579_v6  ;;  %v587_v31 = vmax.f32 %v585_v57, %v586_v7  ;;  %v594_v33 = vmax.f32 %v592_v10, %v593_v8 }
 0x226   :  { %v651_v34 = vadd.f32 %v650_v27, %v649_v48  ;;  %1320 = vpow2.f32 %v629_v24  ;;  %v609_v35 = vsub.f32 %v1775_v45, %v573_v25  ;;  %v610_v36 = vsub.f32 %v1772_v44, %v573_v25  ;;  %v1843_v55 = vpop.permute.xlu1 %789 }
 0x227   :  { %v1835_v58 = vpop.eup %1312  ;;  %1322 = vpow2.f32 %v631_v28  ;;  %v581_v37 = vrot.slane %v580_v29, 1  ;;  %v588_v38 = vrot.slane %v587_v31, 2  ;;  %v595_v40 = vrot.slane %v594_v33, 4 }
 0x228   :  { %v1837_v41 = vpop.eup %1314  ;;  %v652_v42 = vrot.slane %v651_v34, 4  ;;  %v658_v43 = vsel %vm115_vm0, %v1835_v58, 0.0  ;;  %v633_v49 = vmul.f32 1.442695, %v609_v35  ;;  %v635_v51 = vmul.f32 1.442695, %v610_v36 }
 0x229   :  { %v659_v52 = vsel %vm115_vm0, %v1837_v41, 0.0  ;;  %v582_v45 = vmax.f32 %v580_v29, %v581_v37  ;;  %v589_v3 = vmax.f32 %v587_v31, %v588_v38  ;;  %v596_v44 = vmax.f32 %v594_v33, %v595_v40 }
 0x22a   :  { %v653_v1 = vadd.f32 %v652_v42, %v651_v34  ;;  %v660_v54 = vadd.f32 %v659_v52, %v658_v43  ;;  %1324 = vpow2.f32 %v633_v49  ;;  %v1859_v38 = vpop.permute.xlu1 %793 }
 0x22b   :  { %v1845_v57 = vpop.eup %1316  ;;  %1326 = vpow2.f32 %v635_v51  ;;  %v611_v59 = vsub.f32 %v1785_v46, %v582_v45  ;;  %v612_v62 = vsub.f32 %v1782_v50, %v582_v45  ;;  %v590_v63 = vrot.slane %v589_v3, 1 }
 0x22c   :  { %v1849_v0 = vpop.eup %1318  ;;  %v654_v6 = vrot.slane %v653_v1, 2  ;;  %v661_v7 = vrot.slane %v660_v54, 4  ;;  %v667_v8 = vsel %vm115_vm0, %v1845_v57, 0.0  ;;  %v597_v10 = vrot.slane %v596_v44, 2 }
 0x22d   :  { %v668_v48 = vsel %vm115_vm0, %v1849_v0, 0.0  ;;  %v637_v24 = vmul.f32 1.442695, %v611_v59  ;;  %v639_v28 = vmul.f32 1.442695, %v612_v62  ;;  %v591_v25 = vmax.f32 %v589_v3, %v590_v63 }
 0x22e   :  { %v662_v27 = vadd.f32 %v661_v7, %v660_v54  ;;  %v669_v29 = vadd.f32 %v668_v48, %v667_v8  ;;  %v598_v46 = vmax.f32 %v596_v44, %v597_v10  ;;  %v655_v31 = vadd.f32 %v654_v6, %v653_v1  ;;  %v959_v10 = vpop.xlane.xlu0 %958 }
 0x22f   :  { %1328 = vpow2.f32 %v637_v24  ;;  %v613_v50 = vsub.f32 %v1801_v39, %v591_v25  ;;  %v614_v33 = vsub.f32 %v1796_v56, %v591_v25 }
 0x230   :  { %v1857_v34 = vpop.eup %1320  ;;  %v663_v35 = vrot.slane %v662_v27, 2  ;;  %v670_v36 = vrot.slane %v669_v29, 4  ;;  %1330 = vpow2.f32 %v639_v28  ;;  %v599_v37 = vrot.slane %v598_v46, 1 }
 0x231   :  { %v1861_v40 = vpop.eup %1322  ;;  %v676_v42 = vsel %vm115_vm0, %v1857_v34, 0.0  ;;  %v641_v43 = vmul.f32 1.442695, %v613_v50  ;;  %v643_v49 = vmul.f32 1.442695, %v614_v33  ;;  %v656_v51 = vrot.slane %v655_v31, 1 }
 0x232   :  { %v671_v52 = vadd.f32 %v670_v36, %v669_v29  ;;  %v677_v56 = vsel %vm115_vm0, %v1861_v40, 0.0  ;;  %v600_v39 = vmax.f32 %v598_v46, %v599_v37  ;;  %v664_v45 = vadd.f32 %v663_v35, %v662_v27  ;;  %v1877_v27 = vpop.permute.xlu1 %896 }
 0x233   :  { %v678_v3 = vadd.f32 %v677_v56, %v676_v42  ;;  %1332 = vpow2.f32 %v641_v43  ;;  %v657_v44 = vadd.f32 %v656_v51, %v655_v31 }
 0x234   :  { %v1867_v1 = vpop.eup %1324  ;;  %v672_v54 = vrot.slane %v671_v52, 2  ;;  %1334 = vpow2.f32 %v643_v49  ;;  %v615_v59 = vsub.f32 %v1815_v61, %v600_v39  ;;  %v616_v62 = vsub.f32 %v1812_v60, %v600_v39  ;;  %v1887_v49 = vpop.permute.xlu0 %885 }
 0x235   :  { %v1871_v63 = vpop.eup %1326  ;;  %v679_v6 = vrot.slane %v678_v3, 4  ;;  %v685_v7 = vsel %vm115_vm0, %v1867_v1, 0.0  ;;  %v665_v8 = vrot.slane %v664_v45, 1  ;;  %1336 = vrcp.f32 %v657_v44 }
 0x236   :  { %v686_v48 = vsel %vm115_vm0, %v1871_v63, 0.0  ;;  %v645_v24 = vmul.f32 1.442695, %v615_v59  ;;  %v647_v28 = vmul.f32 1.442695, %v616_v62  ;;  %v673_v25 = vadd.f32 %v672_v54, %v671_v52  ;;  %v1889_v56 = vpop.permute.xlu1 %900 }
 0x237   :  { %v680_v61 = vadd.f32 %v679_v6, %v678_v3  ;;  %v687_v29 = vadd.f32 %v686_v48, %v685_v7  ;;  %v666_v60 = vadd.f32 %v665_v8, %v664_v45  ;;  %v960_v7 = vmax.f32 %v959_v10, 1e-09 }
 0x238   :  { %1338 = vpow2.f32 %v645_v24  ;;  %v674_v46 = vrot.slane %v673_v25, 1 }
 0x239   :  { %v1879_v31 = vpop.eup %1328  ;;  %v681_v50 = vrot.slane %v680_v61, 2  ;;  %v688_v33 = vrot.slane %v687_v29, 4  ;;  %1340 = vpow2.f32 %v647_v28 }
 0x23a   :  { %v1881_v35 = vpop.eup %1330  ;;  %v694_v36 = vsel %vm115_vm0, %v1879_v31, 0.0  ;;  %1342 = vrcp.f32 %v666_v60  ;;  %v675_v37 = vadd.f32 %v674_v46, %v673_v25 }
 0x23b   :  { %v689_v42 = vadd.f32 %v688_v33, %v687_v29  ;;  %v695_v43 = vsel %vm115_vm0, %v1881_v35, 0.0  ;;  %v682_v51 = vadd.f32 %v681_v50, %v680_v61  ;;  %v772_v29 = vpop.permute.xlu0 %771 }
 0x23c   :  { %v696_v52 = vadd.f32 %v695_v43, %v694_v36  ;;  %1344 = vrcp.f32 %v675_v37  ;;  %v768_v37 = vpop.permute.xlu1 %767 }
 0x23d   :  { %v1891_v39 = vpop.eup %1332  ;;  %v690_v45 = vrot.slane %v689_v42, 2  ;;  %v683_v3 = vrot.slane %v682_v51, 1 }
 0x23e   :  { %v1893_v44 = vpop.eup %1334  ;;  %v697_v54 = vrot.slane %v696_v52, 4  ;;  %v703_v59 = vsel %vm115_vm0, %v1891_v39, 0.0 }
 0x23f   :  { %v1337_v62 = vpop.eup %1336  ;;  %v704_v6 = vsel %vm115_vm0, %v1893_v44, 0.0  ;;  %v684_v8 = vadd.f32 %v683_v3, %v682_v51  ;;  %v691_v48 = vadd.f32 %v690_v45, %v689_v42 }
 0x240   :  { %v698_v24 = vadd.f32 %v697_v54, %v696_v52  ;;  %v705_v28 = vadd.f32 %v704_v6, %v703_v59  ;;  %v730_v25 = vmul.f32 %v1337_v62, %v1825_v23  ;;  %v729_v61 = vmul.f32 %v1337_v62, %v1819_v2 }
 0x241   :  { %1346 = vrcp.f32 %v684_v8  ;;  %v692_v60 = vrot.slane %v691_v48, 1  ;;  %v858_v23 = vrot.slane %v1809_v53, 2 }
 0x242   :  { %v1901_v46 = vpop.eup %1338  ;;  %v699_v50 = vrot.slane %v698_v24, 2  ;;  %v706_v33 = vrot.slane %v705_v28, 4  ;;  %v746_v36 = vmul.f32 %v730_v25, %v1646_v9  ;;  %v745_v10 = vmul.f32 %v729_v61, %v1642_v5 }
 0x243   :  { %v1905_v43 = vpop.eup %1340  ;;  %v712_v42 = vsel %vm115_vm0, %v1901_v46, 0.0  ;;  %1348 = vrcp.f32 %v960_v7  ;;  %v693_v2 = vadd.f32 %v692_v60, %v691_v48 }
 0x244   :  { %v1343_v51 = vpop.eup %1342  ;;  %v707_v52 = vadd.f32 %v706_v33, %v705_v28  ;;  %v713_v45 = vsel %vm115_vm0, %v1905_v43, 0.0  ;;  %v700_v3 = vadd.f32 %v699_v50, %v698_v24  ;;  %v807_v54 = vmul.f32 %v772_v29, %v746_v36 }
 0x245   :  { %v714_v9 = vadd.f32 %v713_v45, %v712_v42  ;;  %v731_v59 = vmul.f32 %v1343_v51, %v1835_v58  ;;  %v732_v5 = vmul.f32 %v1343_v51, %v1837_v41  ;;  %v806_v62 = vmul.f32 %v768_v37, %v745_v10 }
 0x246   :  { %v1345_v6 = vpop.eup %1344  ;;  %v708_v8 = vrot.slane %v707_v52, 2  ;;  %v701_v25 = vrot.slane %v700_v3, 1  ;;  %v815_v61 = vsel %vm115_vm0, %v807_v54, 0.0  ;;  %1350 = vrcp.f32 %v693_v2 }
 0x247   :  { %v715_v7 = vrot.slane %v714_v9, 4  ;;  %v747_v48 = vmul.f32 %v731_v59, %v1648_v11  ;;  %v748_v28 = vmul.f32 %v732_v5, %v1654_v12  ;;  %v733_v24 = vmul.f32 %v1345_v6, %v1845_v57 }
 0x248   :  { %v702_v29 = vadd.f32 %v701_v25, %v700_v3  ;;  %v734_v60 = vmul.f32 %v1345_v6, %v1849_v0  ;;  %v709_v58 = vadd.f32 %v708_v8, %v707_v52  ;;  %v814_v41 = vsel %vm115_vm0, %v806_v62, 0.0  ;;  %v805_v3 = vpop.permute.xlu0 %804 }
 0x249   :  { %v716_v50 = vadd.f32 %v715_v7, %v714_v9  ;;  %v808_v33 = vmul.f32 %v1787_v4, %v747_v48  ;;  %v809_v36 = vmul.f32 %v1803_v47, %v748_v28  ;;  %v749_v37 = vmul.f32 %v733_v24, %v1656_v13  ;;  %v801_v9 = vpop.permute.xlu1 %800 }
 0x24a   :  { %1352 = vrcp.f32 %v702_v29  ;;  %v750_v11 = vmul.f32 %v734_v60, %v1662_v14  ;;  %v710_v10 = vrot.slane %v709_v58, 1  ;;  %v816_v12 = vadd.f32 %v815_v61, %v814_v41 }
 0x24b   :  { %v1347_v42 = vpop.eup %1346  ;;  %v717_v57 = vrot.slane %v716_v50, 2  ;;  %v823_v2 = vsel %vm115_vm0, %v808_v33, 0.0  ;;  %v824_v0 = vsel %vm115_vm0, %v809_v36, 0.0  ;;  %v810_v51 = vmul.f32 %v1843_v55, %v749_v37 }
 0x24c   :  { %v825_v52 = vadd.f32 %v824_v0, %v823_v2  ;;  %v811_v4 = vmul.f32 %v1859_v38, %v750_v11  ;;  %v711_v45 = vadd.f32 %v710_v10, %v709_v58  ;;  %v817_v47 = vrot.slane %v816_v12, 4  ;;  %v879_v33 = vpop.permute.xlu0 %878 }
 0x24d   :  { %v1928_v13 = vpop.eup %1348  ;;  %v832_v14 = vsel %vm115_vm0, %v810_v51, 0.0  ;;  %v736_v54 = vmul.f32 %v1347_v42, %v1861_v40  ;;  %v735_v59 = vmul.f32 %v1347_v42, %v1857_v34  ;;  %v718_v5 = vadd.f32 %v717_v57, %v716_v50 }
 0x24e   :  { %v826_v62 = vrot.slane %v825_v52, 4  ;;  %v833_v6 = vsel %vm115_vm0, %v811_v4, 0.0  ;;  %1354 = vrcp.f32 %v711_v45  ;;  %v818_v55 = vadd.f32 %v817_v47, %v816_v12  ;;  %v875_v12 = vpop.permute.xlu1 %874 }
 0x24f   :  { %v834_v8 = vadd.f32 %v833_v6, %v832_v14  ;;  %v752_v38 = vmul.f32 %v736_v54, %v1670_v16  ;;  %v751_v25 = vmul.f32 %v735_v59, %v1664_v15  ;;  %v719_v61 = vrot.slane %v718_v5, 1 }
 0x250   :  { %v1351_v7 = vpop.eup %1350  ;;  %v827_v48 = vadd.f32 %v826_v62, %v825_v52  ;;  %v819_v28 = vrot.slane %v818_v55, 2  ;;  %v859_v40 = vrot.slane %v1809_v53, 3  ;;  %v857_v24 = vrot.slane %v1809_v53, 1 }
 0x251   :  { %v835_v34 = vrot.slane %v834_v8, 4  ;;  %v813_v29 = vmul.f32 %v805_v3, %v752_v38  ;;  %v812_v60 = vmul.f32 %v801_v9, %v751_v25  ;;  %v738_v58 = vmul.f32 %v1351_v7, %v1871_v63 }
 0x252   :  { %v828_v41 = vrot.slane %v827_v48, 2  ;;  %v820_v50 = vadd.f32 %v819_v28, %v818_v55  ;;  %v737_v16 = vmul.f32 %v1351_v7, %v1867_v1  ;;  %v720_v36 = vadd.f32 %v719_v61, %v718_v5 }
 0x253   :  { %v836_v15 = vadd.f32 %v835_v34, %v834_v8  ;;  %v842_v37 = vsel %vm115_vm0, %v813_v29, 0.0  ;;  %v841_v11 = vsel %vm115_vm0, %v812_v60, 0.0  ;;  %v754_v10 = vmul.f32 %v738_v58, %v1678_v18 }
 0x254   :  { %v1353_v42 = vpop.eup %1352  ;;  %v829_v57 = vadd.f32 %v828_v41, %v827_v48  ;;  %v821_v2 = vrot.slane %v820_v50, 1  ;;  %v843_v0 = vadd.f32 %v842_v37, %v841_v11  ;;  %v753_v63 = vmul.f32 %v737_v16, %v1672_v17 }
 0x255   :  { %v740_v51 = vmul.f32 %v1353_v42, %v1881_v35  ;;  %v837_v52 = vrot.slane %v836_v15, 2  ;;  %v739_v1 = vmul.f32 %v1353_v42, %v1879_v31  ;;  %v914_v4 = vmul.f32 %v879_v33, %v754_v10 }
 0x256   :  { %v830_v45 = vrot.slane %v829_v57, 1  ;;  %v822_v47 = vadd.f32 %v821_v2, %v820_v50  ;;  %v844_v3 = vrot.slane %v843_v0, 4  ;;  %v913_v14 = vmul.f32 %v875_v12, %v753_v63 }
 0x257   :  { %v756_v54 = vmul.f32 %v740_v51, %v1686_v20  ;;  %v838_v18 = vadd.f32 %v837_v52, %v836_v15  ;;  %v755_v9 = vmul.f32 %v739_v1, %v1680_v19  ;;  %v922_v59 = vsel %vm115_vm0, %v914_v4, 0.0 }
 0x258   :  { %v1355_v5 = vpop.eup %1354  ;;  %v831_v17 = vadd.f32 %v830_v45, %v829_v57  ;;  %v1950_v35 = vmul.f32 %v1809_v53, %v822_v47  ;;  %v845_v62 = vadd.f32 %v844_v3, %v843_v0  ;;  %v921_v31 = vsel %vm115_vm0, %v913_v14, 0.0 }
 0x259   :  { %v916_v6 = vmul.f32 %v1829_v26, %v756_v54  ;;  %v839_v55 = vrot.slane %v838_v18, 1  ;;  %v741_v20 = vmul.f32 %v1355_v5, %v1891_v39  ;;  %v915_v8 = vmul.f32 %v1887_v49, %v755_v9 }
 0x25a   :  { %v742_v19 = vmul.f32 %v1355_v5, %v1893_v44  ;;  %v846_v38 = vrot.slane %v845_v62, 2  ;;  %v923_v25 = vadd.f32 %v922_v59, %v921_v31  ;;  %1356 = vrcp.f32 %v720_v36  ;;  %v912_v59 = vpop.permute.xlu0 %911  ;;  %v908_v5 = vpop.permute.xlu1 %907  ;;  %v1364_v31 = vld [vmem:[#allocation5 + $0x38] sm:$0xff] }
 0x25b   :  { %v931_v61 = vsel %vm115_vm0, %v916_v6, 0.0  ;;  %v840_v7 = vadd.f32 %v839_v55, %v838_v18  ;;  %v757_v48 = vmul.f32 %v741_v20, %v1688_v21  ;;  %v930_v28 = vsel %vm115_vm0, %v915_v8, 0.0  ;;  %v1365_v55 = vld [vmem:[#allocation5 + $0x30] sm:$0xff] }
 0x25c   :  { %v932_v34 = vadd.f32 %v931_v61, %v930_v28  ;;  %v758_v26 = vmul.f32 %v742_v19, %v1694_v22  ;;  %v847_v29 = vadd.f32 %v846_v38, %v845_v62  ;;  %v924_v60 = vrot.slane %v923_v25, 4 }
 0x25d   :  { %v1963_v49 = vmul.f32 %v858_v23, %v840_v7  ;;  %v917_v39 = vmul.f32 %v1877_v27, %v757_v48  ;;  %v1966_v44 = vmul.f32 %v857_v24, %v831_v17  ;;  %v1046_v58 = vmul.f32 %v1950_v35, %v1950_v35 }
 0x25e   :  { %v933_v41 = vrot.slane %v932_v34, 4  ;;  %v918_v21 = vmul.f32 %v1889_v56, %v758_v26  ;;  %v848_v50 = vrot.slane %v847_v29, 1  ;;  %v925_v33 = vadd.f32 %v924_v60, %v923_v25 }
 0x25f   :  { %v939_v22 = vsel %vm115_vm0, %v917_v39, 0.0  ;;  %v1047_v16 = vmul.f32 %v1966_v44, %v1966_v44  ;;  %v1048_v23 = vmul.f32 %v1963_v49, %v1963_v49  ;;  %v986_v27 = vrot.slane %v1966_v44, 7 }
 0x260   :  { %v934_v24 = vadd.f32 %v933_v41, %v932_v34  ;;  %v940_v36 = vsel %vm115_vm0, %v918_v21, 0.0  ;;  %v849_v15 = vadd.f32 %v848_v50, %v847_v29  ;;  %v926_v37 = vrot.slane %v925_v33, 2 }
 0x261   :  { %v941_v11 = vadd.f32 %v940_v36, %v939_v22  ;;  %v1054_v10 = vrot.slane %v1047_v16, 7  ;;  %v1056_v56 = vrot.slane %v1048_v23, 6  ;;  %v989_v12 = vrot.slane %v1963_v49, 6 }
 0x262   :  { %v935_v42 = vrot.slane %v934_v24, 2  ;;  %v1981_v57 = vmul.f32 %v859_v40, %v849_v15  ;;  %v927_v2 = vadd.f32 %v926_v37, %v925_v33  ;;  %v988_v0 = vsel %vm987_vm2, %v986_v27, %v1950_v35 }
 0x263   :  { %v942_v63 = vrot.slane %v941_v11, 4  ;;  %v1055_v51 = vsel %vm987_vm2, %v1054_v10, %v1046_v58  ;;  %v991_v52 = vsel %vm990_vm3, %v989_v12, %v988_v0  ;;  %v964_v33 = vrot.slane %v1928_v13, 2 }
 0x264   :  { %v1357_v1 = vpop.eup %1356  ;;  %v936_v4 = vadd.f32 %v935_v42, %v934_v24  ;;  %v928_v45 = vrot.slane %v927_v2, 1  ;;  %v1049_v47 = vmul.f32 %v1981_v57, %v1981_v57  ;;  %v1057_v53 = vsel %vm990_vm3, %v1056_v56, %v1055_v51 }
 0x265   :  { %v943_v40 = vadd.f32 %v942_v63, %v941_v11  ;;  %v744_v3 = vmul.f32 %v1357_v1, %v1905_v43  ;;  %v743_v14 = vmul.f32 %v1357_v1, %v1901_v46  ;;  %v992_v54 = vrot.slane %v1981_v57, 5 }
 0x266   :  { %v937_v18 = vrot.slane %v936_v4, 1  ;;  %v929_v9 = vadd.f32 %v928_v45, %v927_v2  ;;  %v1058_v17 = vrot.slane %v1049_v47, 5  ;;  %v963_v43 = vrot.slane %v1928_v13, 1 }
 0x267   :  { %v944_v62 = vrot.slane %v943_v40, 2  ;;  %v760_v6 = vmul.f32 %v1364_v31, %v744_v3  ;;  %v759_v20 = vmul.f32 %v1365_v55, %v743_v14  ;;  %v1994_v8 = vsel %vm993_vm4, %v992_v54, %v991_v52 }
 0x268   :  { %v938_v19 = vadd.f32 %v937_v18, %v936_v4  ;;  %v970_v46 = vmul.f32 %v1928_v13, %v929_v9  ;;  %v1059_v38 = vsel %vm993_vm4, %v1058_v17, %v1057_v53 }
 0x269   :  { %v945_v25 = vadd.f32 %v944_v62, %v943_v40  ;;  %v920_v61 = vmul.f32 %v912_v59, %v760_v6  ;;  %v919_v7 = vmul.f32 %v908_v5, %v759_v20  ;;  %v1061_v48 = vsel %vm1042_vm5, %v1059_v38, 0.0 }
 0x26a   :  { %v971_v28 = vmul.f32 %v963_v43, %v938_v19  ;;  %1062 = vadd.xlane.f32.xlu1 %v1061_v48  ;;  %v1027_v34 = vmul.f32 %v970_v46, %v1950_v35  ;;  %v974_v26 = vsub.f32 %v1950_v35, %v970_v46  ;;  %v1072_v16 = vmul.f32 %v970_v46, %v970_v46 }
 0x26b   :  { %v946_v29 = vrot.slane %v945_v25, 1  ;;  %v949_v60 = vsel %vm115_vm0, %v920_v61, 0.0  ;;  %v948_v39 = vsel %vm115_vm0, %v919_v7, 0.0 }
 0x26c   :  { %v950_v58 = vadd.f32 %v949_v60, %v948_v39  ;;  %v1073_v41 = vmul.f32 %v971_v28, %v971_v28  ;;  %v1000_v21 = vrot.slane %v971_v28, 7  ;;  %v1028_v50 = vmul.f32 %v971_v28, %v1966_v44 }
 0x26d   :  { %v947_v22 = vadd.f32 %v946_v29, %v945_v25  ;;  %v975_v23 = vsub.f32 %v1966_v44, %v971_v28  ;;  %v978_v44 = vand.u32 2147483647, %v974_v26 }
 0x26e   :  { %v951_v27 = vrot.slane %v950_v58, 4  ;;  %v1080_v24 = vrot.slane %v1073_v41, 7  ;;  %v1001_v35 = vsel %vm987_vm2, %v1000_v21, %v970_v46  ;;  %v1035_v36 = vrot.slane %v1028_v50, 7 }
 0x26f   :  { %v972_v15 = vmul.f32 %v964_v33, %v947_v22  ;;  %v979_v37 = vand.u32 2147483647, %v975_v23 }
 0x270   :  { %v952_v11 = vadd.f32 %v951_v27, %v950_v58  ;;  %v1081_v10 = vsel %vm987_vm2, %v1080_v24, %v1072_v16  ;;  %v1036_v56 = vsel %vm987_vm2, %v1035_v36, %v1027_v34 }
 0x271   :  { %v1074_v12 = vmul.f32 %v972_v15, %v972_v15  ;;  %v1002_v42 = vrot.slane %v972_v15, 6  ;;  %v1029_v2 = vmul.f32 %v972_v15, %v1963_v49  ;;  %v976_v0 = vsub.f32 %v1963_v49, %v972_v15 }
 0x272   :  { %v953_v63 = vrot.slane %v952_v11, 2  ;;  %v1013_v51 = vrot.slane %v979_v37, 7  ;;  %v965_v49 = vrot.slane %v1928_v13, 3 }
 0x273   :  { %v1082_v52 = vrot.slane %v1074_v12, 6  ;;  %v1003_v1 = vsel %vm990_vm3, %v1002_v42, %v1001_v35  ;;  %v1037_v4 = vrot.slane %v1029_v2, 6  ;;  %v980_v45 = vand.u32 2147483647, %v976_v0 }
 0x274   :  { %v954_v47 = vadd.f32 %v953_v63, %v952_v11  ;;  %v1014_v53 = vsel %vm987_vm2, %v1013_v51, %v978_v44 }
 0x275   :  { %v1083_v40 = vsel %vm990_vm3, %v1082_v52, %v1081_v10  ;;  %v1038_v3 = vsel %vm990_vm3, %v1037_v4, %v1036_v56  ;;  %v1015_v14 = vrot.slane %v980_v45, 6 }
 0x276   :  { %v955_v54 = vrot.slane %v954_v47, 1 }
 0x277   :  { %v1016_v18 = vsel %vm990_vm3, %v1015_v14, %v1014_v53 }
 0x278   :  { %v956_v9 = vadd.f32 %v955_v54, %v954_v47 }
 0x27a   :  { %v973_v59 = vmul.f32 %v965_v49, %v956_v9 }
 0x27c   :  { %v1075_v5 = vmul.f32 %v973_v59, %v973_v59  ;;  %v1004_v17 = vrot.slane %v973_v59, 5  ;;  %v1030_v62 = vmul.f32 %v973_v59, %v1981_v57  ;;  %v977_v31 = vsub.f32 %v1981_v57, %v973_v59 }
 0x27e   :  { %v1084_v6 = vrot.slane %v1075_v5, 5  ;;  %v1005_v55 = vsel %vm993_vm4, %v1004_v17, %v1003_v1  ;;  %v1039_v20 = vrot.slane %v1030_v62, 5  ;;  %v981_v43 = vand.u32 2147483647, %v977_v31 }
 0x27f   :  { %1006 = vrot.lane.b32.xlu1 %v1005_v55, %s1514_s7 }
 0x280   :  { %v1085_v19 = vsel %vm993_vm4, %v1084_v6, %v1083_v40  ;;  %v1040_v46 = vsel %vm993_vm4, %v1039_v20, %v1038_v3  ;;  %v1017_v13 = vrot.slane %v981_v43, 5 }
 0x281   :  { %v1087_v38 = vsel %vm1042_vm5, %v1085_v19, 0.0  ;;  %v1043_v61 = vsel %vm1042_vm5, %v1040_v46, 0.0 }
 0x282   :  { %1088 = vadd.xlane.f32.xlu0 %v1087_v38  ;;  %v1018_v25 = vsel %vm993_vm4, %v1017_v13, %v1016_v18 }
 0x286   :  { %1044 = vadd.xlane.f32.xlu0 %v1043_v61 }
 0x29c   :  { %1019 = vrot.lane.b32.xlu0 %v1018_v25, %s1515_s18 }
 0x2f7   :  { %v1063_v57 = vpop.xlane.xlu1 %1062 }
 0x2f8   :  { %1358 = vrsqrt.f32 %v1063_v57  ;;  %vm1066_vm8 = vcmp.eq.f32.partialorder %v1063_v57, inf  ;;  %v1069_v21 = vand.u32 2147483648, %v1063_v57 }
 0x2fb   :  { %v1007_v34 = vpop.permute.xlu1 %1006 }
 0x2fc   :  { %v1022_v29 = vsel %vm115_vm0, %v1994_v8, %v1007_v34 }
 0x302   :  { %v1359_v48 = vpop.eup %1358 }
 0x303   :  { %v1065_v26 = vmul.f32 %v1359_v48, %v1063_v57 }
 0x305   :  { %v1067_v58 = vsel %vm1066_vm8, %v1063_v57, %v1065_v26 }
 0x30f   :  { %v1089_v7 = vpop.xlane.xlu0 %1088 }
 0x310   :  { %1360 = vrsqrt.f32 %v1089_v7 }
 0x313   :  { %v1045_v28 = vpop.xlane.xlu0 %1044 }
 0x317   :  { %v1020_v60 = vpop.permute.xlu0 %1019 }
 0x318   :  { %v1024_v39 = vsel %vm1023_vm6, %v1022_v29, %v1020_v60 }
 0x319   :  { %1026 = vst.msk [vmem:[#allocation11] sm:$0xf] %vm1025_vm7, %v1024_v39 }
 0x31a   :  { %v1361_v41 = vpop.eup %1360 }
 0x31b   :  { %1465 = shalt.err (!%p1462_p8)
}
 0x31c   :  { %s1466_s26 = scalar_lea.hbm %s2063_s9, 64 }
 0x31d   :  { %p1467_p9 = scmp.ne.s32.totalorder %s2063_s9, %s1466_s26  ;;  %p1470_p10 = scmp.lt.u32.totalorder %s1466_s26, %s2063_s9 }
 0x31f   :  { %p1472_p11 = pnand %p1470_p10, %p1467_p9 }
 0x321   :  { %1475 = shalt.err (!%p1472_p11)
}
 0x322   :  { %1130 = dma.vmem_to_hbm [thread:$0]  %s1128_s20, 64, %s2063_s9, [#allocation12]   ;;  %vm1068_vm9 = vcmp.eq.f32.partialorder %v1063_v57, 0.0  ;;  %v1091_v8 = vmul.f32 %v1361_v41, %v1089_v7  ;;  %vm1092_vm10 = vcmp.eq.f32.partialorder %v1089_v7, inf  ;;  %v1095_v33 = vand.u32 2147483648, %v1089_v7 }
 0x323   :  { %v1070_v50 = vsel %vm1068_vm9, %v1069_v21, %v1067_v58  ;;  %vm1094_vm11 = vcmp.eq.f32.partialorder %v1089_v7, 0.0  ;;  %v1103_v35 = vand.u32 127, %v762_v30  ;;  %s1517_s11 = smov [#allocation10]   ;;  %vm1109_vm12 = vcmask 24576  }
 0x324   :  { %v1093_v22 = vsel %vm1092_vm10, %v1089_v7, %v1091_v8  ;;  %v1071_v23 = vmax.f32 %v1070_v50, 1e-08  ;;  %s1117_s13 = sshll.u32 %s1517_s11, 4  ;;  %s1118_s13 = int_to_ptr.vmem [resolvable:$true] %s1117_s13 }
 0x325   :  { %v1096_v16 = vsel %vm1094_vm11, %v1095_v33, %v1093_v22  ;;  %v1106_v36 = vsub.s32 %v1103_v35, %v1707_v32  ;;  %s1476_s9 = scalar_lea.vmem %s1118_s13, 16  ;;  %s1480_s1 = scalar_lea.vmem %s1118_s13, 32 }
 0x326   :  { %v1097_v27 = vmax.f32 %v1096_v16, 1e-08  ;;  %p1477_p12 = scmp.ne.s32.totalorder %s1118_s13, %s1476_s9  ;;  %p1481_p13 = scmp.lt.s32.totalorder %s1118_s13, %s1118_s13 }
 0x327   :  { %p1482_p0 = scmp.lt.s32.totalorder %s1480_s1, %s1476_s9 }
 0x328   :  { %v1098_v24 = vmul.f32 %v1097_v27, %v1071_v23 }
 0x329   :  { %p1483_p1 = por %p1482_p0, %p1481_p13 }
 0x32a   :  { %1362 = vrcp.f32 %v1098_v24 }
 0x32b   :  { %p1484_p2 = pnand %p1483_p1, %p1477_p12 }
 0x334   :  { %v1363_v15 = vpop.eup %1362 }
 0x335   :  { %v1100_v37 = vmul.f32 %v1363_v15, %v1045_v28 }
 0x337   :  { %v1107_v11 = vrot.slane %v1100_v37, %v1106_v36 }
 0x339   :  { %1110 = vst.msk [vmem:[#allocation10] sm:$0x1] %vm1109_vm12, %v1107_v11 }
 0x33a   :  { %1487 = shalt.err (!%p1484_p2)
}
 0x33b   :  { %s1488_s4 = scalar_lea.hbm %s2062_s8, 16 }
 0x33c   :  { %p1489_p3 = scmp.ne.s32.totalorder %s2062_s8, %s1488_s4  ;;  %p1492_p4 = scmp.lt.u32.totalorder %s1488_s4, %s2062_s8 }
 0x33e   :  { %p1494_p5 = pnand %p1492_p4, %p1489_p3 }
 0x340   :  { %1497 = shalt.err (!%p1494_p5)
}
 0x341   :  { %1120 = dma.vmem_to_hbm [thread:$0]  %s1118_s13, 16, %s2062_s8, [#allocation4]  }
 0x342   :  { %1504 = dma.done.wait [#allocation4], 16  }
 0x343   :  { %1505 = vsyncadd [#allocation4], 4294967280 }
 0x344   :  { %1506 = dma.done.wait [#allocation12], 64  }
 0x345   :  { %1507 = vsyncadd [#allocation12], 4294967232 }
 0x346   :  { %1137 = vsyncpa [#allocation3], 1 }
 0x347   :  { %1138 = vsyncpa [#allocation6], 1 }
 0x348   :  { %1139 = vsyncpa [#allocation9], 1 }
 0x349   :  { %1140 = vsyncpa [#allocation4], 1 }
 0x34a   :  { %1141 = vsyncpa [#allocation12], 1 }

</bundles_post_ra>
